<compile_context>
chip_gen: v7x
topology: tpu7x:2x2x1
jax: 0.10.0
libtpu: 0.0.40
codegen_flags: <defaults>
</compile_context>

<pallas_src>
import functools

import jax
import jax.numpy as jnp
import numpy as np
from jax.experimental import pallas as pl
from jax.experimental.pallas import tpu as pltpu


# --------------------------------------------------------------------------
# VMEM / tiling helpers
# --------------------------------------------------------------------------
def _vmem_limit_bytes():
    """Generation-aware scoped-VMEM budget: ~70% of physical VMEM, capped at
    96 MiB  (~90 MiB on v5e/v6e's 128 MiB, ~45 MiB on v7x's 64 MiB)."""
    try:
        cap = int(pltpu.get_tpu_info().vmem_capacity_bytes)
    except Exception:
        cap = 64 << 20  # conservative (v7x-sized) fallback
    return min(96 << 20, (cap * 7) // 10)


def _pick_tile(total, unit_bytes, budget_bytes, multiple_of=1, ensure_split=True):
    """Largest divisor of `total` (a multiple of `multiple_of`, or `total` itself)
    whose block fits the VMEM budget; prefers a grid extent >= 2 so megacore /
    both v7x TensorCores get work."""
    divs = [d for d in range(1, total + 1)
            if total % d == 0 and (d % multiple_of == 0 or d == total)]
    fits = [d for d in divs if d * unit_bytes <= budget_bytes] or [divs[0]]
    if ensure_split and fits[-1] == total and len(fits) > 1:
        return fits[-2]
    return fits[-1]


# --------------------------------------------------------------------------
# Weight / bias packing (host side, tiny tensors, fuses under jit)
# --------------------------------------------------------------------------
def _pack_spatial_weights(w_hwio, W, dtype):
    """(KH, KW, C, Co) HWIO -> banded (KH, (W+2pw)*C, W*Co):
    BigW[kh, win*C + c, x*Co + d] = w[kh, win - x, c, d]  (0 <= win - x < KW).
    One (TN*H, (W+2pw)*C) @ BigW[kh] dot then computes the full row conv."""
    KH, KW, C, Co = w_hwio.shape
    pw = KW // 2
    Wp = W + 2 * pw
    ind = np.zeros((KW, Wp, W), np.float32)           # static indicator, built once
    for kw in range(KW):
        ind[kw, kw + np.arange(W), np.arange(W)] = 1.0
    big = jnp.einsum("kix,hkcd->hicxd", jnp.asarray(ind), w_hwio)
    return big.reshape(KH, Wp * C, W * Co).astype(dtype)


def _pack_temporal_weights(w_kio, W, dtype):
    """(K, Ci, Co) -> block-diagonal (K, W*Ci, W*Co): per-pixel channel mix."""
    K, Ci, Co = w_kio.shape
    big = jnp.einsum("wx,kcd->kwcxd", jnp.eye(W, dtype=jnp.float32), w_kio)
    return big.reshape(K, W * Ci, W * Co).astype(dtype)


def _pack_bias(bias, W):
    """(Co,) -> (1, W*Co) f32 so it broadcasts onto the flat-lane accumulator."""
    return jnp.tile(bias.astype(jnp.float32), W).reshape(1, -1)


# --------------------------------------------------------------------------
# Spatial Conv2d (SAME, stride 1) on the flat (N, H, W*C) layout
# --------------------------------------------------------------------------
def _spatial_conv_kernel(xp_ref, w_ref, b_ref, o_ref, *, H, KH):
    TN = o_ref.shape[0]
    WCo = o_ref.shape[-1]
    acc = jnp.zeros((TN * H, WCo), jnp.float32)
    # KH big-K dots (K = (W+2pw)*C) instead of KH*KW tiny K=C matmuls.
    for kh in range(KH):                                   # static unroll
        slab = xp_ref[:, kh:kh + H, :]                     # (TN, H, (W+2pw)*C)
        acc = acc + jnp.dot(slab.reshape(TN * H, slab.shape[-1]), w_ref[kh],
                            preferred_element_type=jnp.float32)
    acc = acc + b_ref[...].astype(jnp.float32)             # (1, W*Co) broadcast
    o_ref[...] = acc.reshape(TN, H, WCo).astype(o_ref.dtype)


def spatial_conv2d_flat(x_nhwc, w_hwio, bias, *, vmem_limit=None):
    """SAME-padded stride-1 Conv2d.  x_nhwc: (N, H, W, C); returns (N, H, W*Co)."""
    N, H, W, C = x_nhwc.shape
    KH, KW, _, Co = w_hwio.shape
    assert KH % 2 == 1 and KW % 2 == 1, "odd kernel sizes only (SAME padding)"
    ph, pw = KH // 2, KW // 2
    Wp = W + 2 * pw
    dtype = x_nhwc.dtype
    vmem_limit = vmem_limit or _vmem_limit_bytes()

    # The pad fuses with the producing transpose/cast under jit (one HBM copy);
    # the trailing reshape to a flat (W+2pw)*C lane axis is metadata-only.
    xp = jnp.pad(x_nhwc, ((0, 0), (ph, ph), (pw, pw), (0, 0)))
    xp = xp.reshape(N, H + 2 * ph, Wp * C)

    w_big = _pack_spatial_weights(w_hwio, W, dtype)        # (KH, Wp*C, W*Co)
    b_big = _pack_bias(bias, W)                            # (1, W*Co) f32

    itemsize = jnp.dtype(dtype).itemsize
    per_frame = ((H + 2 * ph) * Wp * C * (1 + KH) + H * W * Co * 2) * itemsize \
        + H * W * Co * 4 * 2
    TN = _pick_tile(N, per_frame, vmem_limit // 2)

    kernel = functools.partial(_spatial_conv_kernel, H=H, KH=KH)
    return pl.pallas_call(
        kernel,
        out_shape=jax.ShapeDtypeStruct((N, H, W * Co), dtype),
        grid=(N // TN,),
        in_specs=[
            pl.BlockSpec((TN, H + 2 * ph, Wp * C), lambda i: (i, 0, 0)),
            pl.BlockSpec((KH, Wp * C, W * Co), lambda i: (0, 0, 0)),
            pl.BlockSpec((1, W * Co), lambda i: (0, 0)),
        ],
        out_specs=pl.BlockSpec((TN, H, W * Co), lambda i: (i, 0, 0)),
        compiler_params=pltpu.CompilerParams(
            dimension_semantics=("parallel",),
            vmem_limit_bytes=vmem_limit),
    )(xp, w_big, b_big)


# --------------------------------------------------------------------------
# Temporal Conv1d (SAME, stride 1) applied in place on the (B, F, H, W*C) layout
# --------------------------------------------------------------------------
def _temporal_conv_kernel(y_ref, w_ref, b_ref, o_ref, *, F, K, pad):
    _, _, TH, WCo = o_ref.shape
    WCi = y_ref.shape[-1]
    x = y_ref[0]                                           # (F, TH, W*Ci)
    # In-VMEM frame halo: no host-side jnp.pad / extra HBM pass.
    zeros = jnp.zeros((pad, TH, WCi), x.dtype)
    xp = jnp.concatenate([zeros, x, zeros], axis=0)        # (F+2p, TH, W*Ci)
    acc = jnp.zeros((F * TH, WCo), jnp.float32)
    for k in range(K):                                     # static unroll
        slab = xp[k:k + F]                                 # leading-axis slice (cheap)
        acc = acc + jnp.dot(slab.reshape(F * TH, WCi), w_ref[k],
                            preferred_element_type=jnp.float32)
    acc = acc + b_ref[...].astype(jnp.float32)
    o_ref[...] = acc.reshape(1, F, TH, WCo).astype(o_ref.dtype)


def temporal_conv1d_fused(y_bfhc, w_kio, bias, *, W, vmem_limit=None):
    """Conv1d over the frame axis, consuming the spatial output's
    (B, F, H, W*Ci) layout directly (no transpose between the stages)."""
    B, F, H, WCi = y_bfhc.shape
    K, Ci, Co = w_kio.shape
    assert K % 2 == 1 and WCi == W * Ci
    pad = K // 2
    dtype = y_bfhc.dtype
    vmem_limit = vmem_limit or _vmem_limit_bytes()

    w_big = _pack_temporal_weights(w_kio, W, dtype)        # (K, W*Ci, W*Co)
    b_big = _pack_bias(bias, W)                            # (1, W*Co) f32

    itemsize = jnp.dtype(dtype).itemsize
    per_row = (F * W * Ci * (2 + K) + F * W * Co * 2) * itemsize + F * W * Co * 4 * 2
    TH = _pick_tile(H, per_row, vmem_limit // 2,
                    multiple_of=8, ensure_split=(B == 1))

    kernel = functools.partial(_temporal_conv_kernel, F=F, K=K, pad=pad)
    return pl.pallas_call(
        kernel,
        out_shape=jax.ShapeDtypeStruct((B, F, H, W * Co), dtype),
        grid=(B, H // TH),
        in_specs=[
            pl.BlockSpec((1, F, TH, W * Ci), lambda ib, ih: (ib, 0, ih, 0)),
            pl.BlockSpec((K, W * Ci, W * Co), lambda ib, ih: (0, 0, 0)),
            pl.BlockSpec((1, W * Co), lambda ib, ih: (0, 0)),
        ],
        out_specs=pl.BlockSpec((1, F, TH, W * Co), lambda ib, ih: (ib, 0, ih, 0)),
        compiler_params=pltpu.CompilerParams(
            dimension_semantics=("parallel", "parallel"),
            vmem_limit_bytes=vmem_limit),
    )(y_bfhc, w_big, b_big)


# --------------------------------------------------------------------------
# PseudoConv3d forward
# --------------------------------------------------------------------------
def pseudo_conv3d(x, params, enable_time=True, compute_dtype=None):
    """Forward pass.  x: (b, c, f, h, w) video or (b, c, h, w) image (torch layout).
    compute_dtype=jnp.bfloat16 halves HBM/VMEM traffic (f32 accumulation kept)."""
    is_video = x.ndim == 5
    enable_time = bool(enable_time) and is_video
    dtype = jnp.dtype(compute_dtype) if compute_dtype is not None else x.dtype

    w_sp = params["w_spatial"].astype(dtype)
    b_sp = params["b_spatial"]
    co = w_sp.shape[-1]

    if is_video:
        b, c, f, h, w = x.shape
        # single layout pass: transpose + cast (+pad inside the wrapper) fuse in XLA
        x2 = x.transpose(0, 2, 3, 4, 1).reshape(b * f, h, w, c).astype(dtype)
    else:
        b, c, h, w = x.shape
        x2 = x.transpose(0, 2, 3, 1).astype(dtype)

    y = spatial_conv2d_flat(x2, w_sp, b_sp)                # (N, H, W*Co), lane-dense

    if not is_video:
        return y.reshape(b, h, w, co).transpose(0, 3, 1, 2)     # (b, co, h, w)

    if enable_time and params.get("w_temporal") is not None:
        yt = temporal_conv1d_fused(y.reshape(b, f, h, w * co),  # metadata-only view
                                   params["w_temporal"].astype(dtype),
                                   params["b_temporal"], W=w)
    else:
        yt = y.reshape(b, f, h, w * co)

    # single layout pass back to the torch (b, c, f, h, w) output contract
    return yt.reshape(b, f, h, w, co).transpose(0, 4, 1, 2, 3)


# --------------------------------------------------------------------------
# Pure-JAX reference (f32)
# --------------------------------------------------------------------------
def reference_pseudo_conv3d(x, params, enable_time=True):
    b, c, f, h, w = x.shape
    x2 = x.transpose(0, 2, 3, 4, 1).reshape(b * f, h, w, c)
    y = jax.lax.conv_general_dilated(
        x2, params["w_spatial"], (1, 1), "SAME",
        dimension_numbers=("NHWC", "HWIO", "NHWC")) + params["b_spatial"]
    co = y.shape[-1]
    y = y.reshape(b, f, h, w, co)
    wt = params.get("w_temporal")
    if enable_time and wt is not None:
        K = wt.shape[0]
        pt = K // 2
        yp = jnp.pad(y, ((0, 0), (pt, pt), (0, 0), (0, 0), (0, 0)))
        y = sum(jnp.einsum("bfhwc,cd->bfhwd", yp[:, k:k + f], wt[k])
                for k in range(K))
        y = y + params["b_temporal"]
    return y.transpose(0, 4, 1, 2, 3)


# --------------------------------------------------------------------------
# main
# --------------------------------------------------------------------------
if __name__ == "__main__":
    b, c, f, h, w = 2, 4, 8, 16, 16
    dim, dim_out, ks = c, c, 3

    key = jax.random.PRNGKey(0)
    k1, k2, k3, k4, k5 = jax.random.split(key, 5)
    x = jax.random.normal(k1, (b, c, f, h, w), jnp.float32)

    # Parameters exactly as the module's __init__ (Conv2d default init; dirac temporal).
    fan_in = dim * ks * ks
    bound = 1.0 / np.sqrt(fan_in)
    w_spatial = jax.random.uniform(k2, (ks, ks, dim, dim_out), jnp.float32,
                                   -bound, bound)                    # HWIO
    b_spatial = jax.random.uniform(k3, (dim_out,), jnp.float32, -bound, bound)
    # temporal weight layout (k, ci, co):  w[k, ci, co] == torch_weight[co, ci, k]
    w_temporal = jnp.zeros((ks, dim_out, dim_out), jnp.float32).at[ks // 2].set(
        jnp.eye(dim_out, dtype=jnp.float32))                         # nn.init.dirac_
    b_temporal = jnp.zeros((dim_out,), jnp.float32)
    params = dict(w_spatial=w_spatial, b_spatial=b_spatial,
                  w_temporal=w_temporal, b_temporal=b_temporal)

    fwd = jax.jit(pseudo_conv3d, static_argnames=("enable_time", "compute_dtype"))

    # 1) video path with the module's dirac-initialized temporal conv
    out = jax.block_until_ready(fwd(x, params, enable_time=True))
    assert out.shape == (b, dim_out, f, h, w)
    ref = reference_pseudo_conv3d(x, params, enable_time=True)
    np.testing.assert_allclose(np.asarray(out), np.asarray(ref), rtol=1e-4, atol=1e-4)

    # 2) non-trivial temporal weights (exercise the temporal channel-mix matmul)
    params_rand = dict(
        params,
        w_temporal=jax.random.uniform(k4, (ks, dim_out, dim_out), jnp.float32, -0.3, 0.3),
        b_temporal=jax.random.uniform(k5, (dim_out,), jnp.float32, -0.1, 0.1))
    out_r = jax.block_until_ready(fwd(x, params_rand, enable_time=True))
    ref_r = reference_pseudo_conv3d(x, params_rand, enable_time=True)
    np.testing.assert_allclose(np.asarray(out_r), np.asarray(ref_r), rtol=1e-4, atol=1e-4)

    # 3) image (4-D) path -- with dirac temporal weights frame 0 of the video ref matches
    out_img = jax.block_until_ready(fwd(x[:, :, 0], params))
    np.testing.assert_allclose(np.asarray(out_img), np.asarray(ref)[:, :, 0],
                               rtol=1e-4, atol=1e-4)

    # 4) bf16 storage/compute path (f32 accumulation in-kernel)
    out_bf = jax.block_until_ready(fwd(x, params_rand, enable_time=True,
                                       compute_dtype=jnp.bfloat16))
    np.testing.assert_allclose(np.asarray(out_bf.astype(jnp.float32)),
                               np.asarray(ref_r), rtol=5e-2, atol=5e-2)

    print("KERNEL_OK")
</pallas_src>

<mosaic_0001>
module attributes {stable_mosaic.version = 11 : i64} {
  func.func @_spatial_conv_kernel(%arg0: i32, %arg1: memref<8x18x72xf32, #tpu.memory_space<vmem>>, %arg2: memref<3x72x64xf32, #tpu.memory_space<vmem>>, %arg3: memref<1x64xf32, #tpu.memory_space<vmem>>, %arg4: memref<8x16x64xf32, #tpu.memory_space<vmem>>) attributes {dimension_semantics = [#tpu.dimension_semantics<parallel>], iteration_bounds = array<i64: 2>, scalar_prefetch = 0 : i64, scratch_operands = 0 : i64, tpu.core_type = #tpu.core_type<tc>, window_params = [{transform_indices = @transform_0, window_bounds = array<i64: 8, 18, 72>}, {pipeline_mode = #tpu.pipeline_mode<synchronous>, transform_indices = @transform_1, window_bounds = array<i64: 3, 72, 64>}, {pipeline_mode = #tpu.pipeline_mode<synchronous>, transform_indices = @transform_2, window_bounds = array<i64: 1, 64>}, {transform_indices = @transform_3, window_bounds = array<i64: 8, 16, 64>}]} {
    %cst = arith.constant 0.000000e+00 : f32
    %0 = vector.broadcast %cst : f32 to vector<128x64xf32>
    %c0 = arith.constant 0 : index
    %c0_0 = arith.constant 0 : index
    %c0_1 = arith.constant 0 : index
    %1 = vector.load %arg1[%c0, %c0_0, %c0_1] : memref<8x18x72xf32, #tpu.memory_space<vmem>>, vector<8x16x72xf32>
    %2 = vector.shape_cast %1 : vector<8x16x72xf32> to vector<128x72xf32>
    %c0_2 = arith.constant 0 : index
    %c0_3 = arith.constant 0 : index
    %c0_4 = arith.constant 0 : index
    %3 = vector.load %arg2[%c0_2, %c0_3, %c0_4] : memref<3x72x64xf32, #tpu.memory_space<vmem>>, vector<1x72x64xf32>
    %4 = vector.shape_cast %3 : vector<1x72x64xf32> to vector<72x64xf32>
    %cst_5 = arith.constant dense<0.000000e+00> : vector<128x64xf32>
    %5 = tpu.matmul %2, %4, %cst_5 {dimension_numbers = #tpu.dot_dimension_numbers<[1], [0], [0], [1], [0, 0, 1, 1], [], []>} : vector<128x72xf32>, vector<72x64xf32>, vector<128x64xf32> -> vector<128x64xf32>
    %6 = arith.addf %0, %5 : vector<128x64xf32>
    %c0_6 = arith.constant 0 : index
    %c1 = arith.constant 1 : index
    %c0_7 = arith.constant 0 : index
    %7 = vector.load %arg1[%c0_6, %c1, %c0_7] : memref<8x18x72xf32, #tpu.memory_space<vmem>>, vector<8x16x72xf32>
    %8 = vector.shape_cast %7 : vector<8x16x72xf32> to vector<128x72xf32>
    %c1_8 = arith.constant 1 : index
    %c0_9 = arith.constant 0 : index
    %c0_10 = arith.constant 0 : index
    %9 = vector.load %arg2[%c1_8, %c0_9, %c0_10] : memref<3x72x64xf32, #tpu.memory_space<vmem>>, vector<1x72x64xf32>
    %10 = vector.shape_cast %9 : vector<1x72x64xf32> to vector<72x64xf32>
    %cst_11 = arith.constant dense<0.000000e+00> : vector<128x64xf32>
    %11 = tpu.matmul %8, %10, %cst_11 {dimension_numbers = #tpu.dot_dimension_numbers<[1], [0], [0], [1], [0, 0, 1, 1], [], []>} : vector<128x72xf32>, vector<72x64xf32>, vector<128x64xf32> -> vector<128x64xf32>
    %12 = arith.addf %6, %11 : vector<128x64xf32>
    %c0_12 = arith.constant 0 : index
    %c2 = arith.constant 2 : index
    %c0_13 = arith.constant 0 : index
    %13 = vector.load %arg1[%c0_12, %c2, %c0_13] : memref<8x18x72xf32, #tpu.memory_space<vmem>>, vector<8x16x72xf32>
    %14 = vector.shape_cast %13 : vector<8x16x72xf32> to vector<128x72xf32>
    %c2_14 = arith.constant 2 : index
    %c0_15 = arith.constant 0 : index
    %c0_16 = arith.constant 0 : index
    %15 = vector.load %arg2[%c2_14, %c0_15, %c0_16] : memref<3x72x64xf32, #tpu.memory_space<vmem>>, vector<1x72x64xf32>
    %16 = vector.shape_cast %15 : vector<1x72x64xf32> to vector<72x64xf32>
    %cst_17 = arith.constant dense<0.000000e+00> : vector<128x64xf32>
    %17 = tpu.matmul %14, %16, %cst_17 {dimension_numbers = #tpu.dot_dimension_numbers<[1], [0], [0], [1], [0, 0, 1, 1], [], []>} : vector<128x72xf32>, vector<72x64xf32>, vector<128x64xf32> -> vector<128x64xf32>
    %18 = arith.addf %12, %17 : vector<128x64xf32>
    %c0_18 = arith.constant 0 : index
    %c0_19 = arith.constant 0 : index
    %19 = vector.load %arg3[%c0_18, %c0_19] : memref<1x64xf32, #tpu.memory_space<vmem>>, vector<1x64xf32>
    %20 = vector.broadcast %19 : vector<1x64xf32> to vector<128x64xf32>
    %21 = arith.addf %18, %20 : vector<128x64xf32>
    %22 = vector.shape_cast %21 : vector<128x64xf32> to vector<8x16x64xf32>
    %c0_20 = arith.constant 0 : index
    %c0_21 = arith.constant 0 : index
    %c0_22 = arith.constant 0 : index
    %23 = vector.load %arg4[%c0_20, %c0_21, %c0_22] : memref<8x16x64xf32, #tpu.memory_space<vmem>>, vector<8x16x64xf32>
    tpu.vector_store %arg4[%c0_20, %c0_21, %c0_22], %22 {strides = array<i32>} : memref<8x16x64xf32, #tpu.memory_space<vmem>>, vector<8x16x64xf32>,
    return
  }
  func.func @transform_0(%arg0: i32) -> (i32, i32, i32) {
    %c0_i32 = arith.constant 0 : i32
    %c0_i32_0 = arith.constant 0 : i32
    %c0_i32_1 = arith.constant 0 : i32
    return %arg0, %c0_i32, %c0_i32_0 : i32, i32, i32
  }
  func.func @transform_1(%arg0: i32) -> (i32, i32, i32) {
    %c0_i32 = arith.constant 0 : i32
    %c0_i32_0 = arith.constant 0 : i32
    %c0_i32_1 = arith.constant 0 : i32
    %c0_i32_2 = arith.constant 0 : i32
    return %c0_i32, %c0_i32_0, %c0_i32_1 : i32, i32, i32
  }
  func.func @transform_2(%arg0: i32) -> (i32, i32) {
    %c0_i32 = arith.constant 0 : i32
    %c0_i32_0 = arith.constant 0 : i32
    %c0_i32_1 = arith.constant 0 : i32
    return %c0_i32, %c0_i32_0 : i32, i32
  }
  func.func @transform_3(%arg0: i32) -> (i32, i32, i32) {
    %c0_i32 = arith.constant 0 : i32
    %c0_i32_0 = arith.constant 0 : i32
    %c0_i32_1 = arith.constant 0 : i32
    return %arg0, %c0_i32, %c0_i32_0 : i32, i32, i32
  }
}

module attributes {stable_mosaic.version = 11 : i64} {
  func.func @_temporal_conv_kernel(%arg0: i32, %arg1: i32, %arg2: memref<1x8x16x64xf32, #tpu.memory_space<vmem>>, %arg3: memref<3x64x64xf32, #tpu.memory_space<vmem>>, %arg4: memref<1x64xf32, #tpu.memory_space<vmem>>, %arg5: memref<1x8x16x64xf32, #tpu.memory_space<vmem>>) attributes {dimension_semantics = [#tpu.dimension_semantics<parallel>, #tpu.dimension_semantics<parallel>], iteration_bounds = array<i64: 2, 1>, scalar_prefetch = 0 : i64, scratch_operands = 0 : i64, tpu.core_type = #tpu.core_type<tc>, window_params = [{transform_indices = @transform_0, window_bounds = array<i64: 1, 8, 16, 64>}, {pipeline_mode = #tpu.pipeline_mode<synchronous>, transform_indices = @transform_1, window_bounds = array<i64: 3, 64, 64>}, {pipeline_mode = #tpu.pipeline_mode<synchronous>, transform_indices = @transform_2, window_bounds = array<i64: 1, 64>}, {transform_indices = @transform_3, window_bounds = array<i64: 1, 8, 16, 64>}]} {
    %c0 = arith.constant 0 : index
    %c0_0 = arith.constant 0 : index
    %c0_1 = arith.constant 0 : index
    %c0_2 = arith.constant 0 : index
    %0 = vector.load %arg2[%c0, %c0_0, %c0_1, %c0_2] : memref<1x8x16x64xf32, #tpu.memory_space<vmem>>, vector<1x8x16x64xf32>
    %1 = vector.shape_cast %0 : vector<1x8x16x64xf32> to vector<8x16x64xf32>
    %cst = arith.constant 0.000000e+00 : f32
    %2 = vector.broadcast %cst : f32 to vector<1x16x64xf32>
    %3 = tpu.concatenate %2, %1, %2 in 0 : vector<1x16x64xf32>, vector<8x16x64xf32>, vector<1x16x64xf32> -> vector<10x16x64xf32>
    %cst_3 = arith.constant 0.000000e+00 : f32
    %4 = vector.broadcast %cst_3 : f32 to vector<128x64xf32>
    %5 = vector.extract_strided_slice %3 {offsets = [0, 0, 0], sizes = [8, 16, 64], strides = [1, 1, 1]} : vector<10x16x64xf32> to vector<8x16x64xf32>
    %6 = vector.shape_cast %5 : vector<8x16x64xf32> to vector<128x64xf32>
    %c0_4 = arith.constant 0 : index
    %c0_5 = arith.constant 0 : index
    %c0_6 = arith.constant 0 : index
    %7 = vector.load %arg3[%c0_4, %c0_5, %c0_6] : memref<3x64x64xf32, #tpu.memory_space<vmem>>, vector<1x64x64xf32>
    %8 = vector.shape_cast %7 : vector<1x64x64xf32> to vector<64x64xf32>
    %cst_7 = arith.constant dense<0.000000e+00> : vector<128x64xf32>
    %9 = tpu.matmul %6, %8, %cst_7 {dimension_numbers = #tpu.dot_dimension_numbers<[1], [0], [0], [1], [0, 0, 1, 1], [], []>} : vector<128x64xf32>, vector<64x64xf32>, vector<128x64xf32> -> vector<128x64xf32>
    %10 = arith.addf %4, %9 : vector<128x64xf32>
    %11 = vector.extract_strided_slice %3 {offsets = [1, 0, 0], sizes = [8, 16, 64], strides = [1, 1, 1]} : vector<10x16x64xf32> to vector<8x16x64xf32>
    %12 = vector.shape_cast %11 : vector<8x16x64xf32> to vector<128x64xf32>
    %c1 = arith.constant 1 : index
    %c0_8 = arith.constant 0 : index
    %c0_9 = arith.constant 0 : index
    %13 = vector.load %arg3[%c1, %c0_8, %c0_9] : memref<3x64x64xf32, #tpu.memory_space<vmem>>, vector<1x64x64xf32>
    %14 = vector.shape_cast %13 : vector<1x64x64xf32> to vector<64x64xf32>
    %cst_10 = arith.constant dense<0.000000e+00> : vector<128x64xf32>
    %15 = tpu.matmul %12, %14, %cst_10 {dimension_numbers = #tpu.dot_dimension_numbers<[1], [0], [0], [1], [0, 0, 1, 1], [], []>} : vector<128x64xf32>, vector<64x64xf32>, vector<128x64xf32> -> vector<128x64xf32>
    %16 = arith.addf %10, %15 : vector<128x64xf32>
    %17 = vector.extract_strided_slice %3 {offsets = [2, 0, 0], sizes = [8, 16, 64], strides = [1, 1, 1]} : vector<10x16x64xf32> to vector<8x16x64xf32>
    %18 = vector.shape_cast %17 : vector<8x16x64xf32> to vector<128x64xf32>
    %c2 = arith.constant 2 : index
    %c0_11 = arith.constant 0 : index
    %c0_12 = arith.constant 0 : index
    %19 = vector.load %arg3[%c2, %c0_11, %c0_12] : memref<3x64x64xf32, #tpu.memory_space<vmem>>, vector<1x64x64xf32>
    %20 = vector.shape_cast %19 : vector<1x64x64xf32> to vector<64x64xf32>
    %cst_13 = arith.constant dense<0.000000e+00> : vector<128x64xf32>
    %21 = tpu.matmul %18, %20, %cst_13 {dimension_numbers = #tpu.dot_dimension_numbers<[1], [0], [0], [1], [0, 0, 1, 1], [], []>} : vector<128x64xf32>, vector<64x64xf32>, vector<128x64xf32> -> vector<128x64xf32>
    %22 = arith.addf %16, %21 : vector<128x64xf32>
    %c0_14 = arith.constant 0 : index
    %c0_15 = arith.constant 0 : index
    %23 = vector.load %arg4[%c0_14, %c0_15] : memref<1x64xf32, #tpu.memory_space<vmem>>, vector<1x64xf32>
    %24 = vector.broadcast %23 : vector<1x64xf32> to vector<128x64xf32>
    %25 = arith.addf %22, %24 : vector<128x64xf32>
    %26 = vector.shape_cast %25 : vector<128x64xf32> to vector<1x8x16x64xf32>
    %c0_16 = arith.constant 0 : index
    %c0_17 = arith.constant 0 : index
    %c0_18 = arith.constant 0 : index
    %c0_19 = arith.constant 0 : index
    %27 = vector.load %arg5[%c0_16, %c0_17, %c0_18, %c0_19] : memref<1x8x16x64xf32, #tpu.memory_space<vmem>>, vector<1x8x16x64xf32>
    tpu.vector_store %arg5[%c0_16, %c0_17, %c0_18, %c0_19], %26 {strides = array<i32>} : memref<1x8x16x64xf32, #tpu.memory_space<vmem>>, vector<1x8x16x64xf32>,
    return
  }
  func.func @transform_0(%arg0: i32, %arg1: i32) -> (i32, i32, i32, i32) {
    %c0_i32 = arith.constant 0 : i32
    %c0_i32_0 = arith.constant 0 : i32
    %c0_i32_1 = arith.constant 0 : i32
    return %arg0, %c0_i32, %arg1, %c0_i32_0 : i32, i32, i32, i32
  }
  func.func @transform_1(%arg0: i32, %arg1: i32) -> (i32, i32, i32) {
    %c0_i32 = arith.constant 0 : i32
    %c0_i32_0 = arith.constant 0 : i32
    %c0_i32_1 = arith.constant 0 : i32
    %c0_i32_2 = arith.constant 0 : i32
    return %c0_i32, %c0_i32_0, %c0_i32_1 : i32, i32, i32
  }
  func.func @transform_2(%arg0: i32, %arg1: i32) -> (i32, i32) {
    %c0_i32 = arith.constant 0 : i32
    %c0_i32_0 = arith.constant 0 : i32
    %c0_i32_1 = arith.constant 0 : i32
    return %c0_i32, %c0_i32_0 : i32, i32
  }
  func.func @transform_3(%arg0: i32, %arg1: i32) -> (i32, i32, i32, i32) {
    %c0_i32 = arith.constant 0 : i32
    %c0_i32_0 = arith.constant 0 : i32
    %c0_i32_1 = arith.constant 0 : i32
    return %arg0, %c0_i32, %arg1, %c0_i32_0 : i32, i32, i32, i32
  }
}

</mosaic_0001>

<bundles_post_ra>
// kernel: tile.13
= control target key start
LH: loop header
LB: loop body
LE: loop exit
PB: predicated region body
PF: predicated region fallthrough
CT: control target
= control target key end

     0   :  { %s28_s0 = inlined_call_operand.vmem [shape: f32[4], index: 0, kind: input, shape index: {}]   ;;  %s29_s1 = inlined_call_operand.vmem [shape: f32[16,4], index: 1, kind: output, shape index: {}]  }
   0x1   :  { %v4_v0 = vld [vmem:[%s28_s0] ss:$0 sm:$0xff] }
   0x2   :  { %5 = vst [vmem:[%s29_s1] sm:$0xff] %v4_v0  ;;  %8 = vst [vmem:[%s29_s1 + $0x8] sm:$0xff] %v4_v0 }

// kernel: tile.14
= control target key start
LH: loop header
LB: loop body
LE: loop exit
PB: predicated region body
PF: predicated region fallthrough
CT: control target
= control target key end

     0   :  { %s131_s10 = smov 60   ;;  %s132_s11 = smov 52   ;;  %vm3_vm0 = vcmask 31744   ;;  %vm9_vm1 = vcmask 523744   ;;  %vm15_vm2 = vcmask 490944   ;;  %vm21_vm3 = vcmask 458144   ;;  %s207_s0 = inlined_call_operand.vmem [shape: f32[16,4], index: 0, kind: input, shape index: {}]   ;;  %s208_s1 = inlined_call_operand.vmem [shape: f32[1,64], index: 1, kind: output, shape index: {}]  }
   0x1   :  { %v101_v0 = vld [vmem:[%s207_s0 + $0xf] sm:$0x1]   ;;  %v103_v1 = vld [vmem:[%s207_s0 + $0xd] sm:$0x1]   ;;  %v102_v2 = vld [vmem:[%s207_s0 + $0xe] sm:$0x1]  }
   0x2   :  { %7 = vrot.lane.b32.xlu0 %v101_v0, %s131_s10  ;;  %19 = vrot.lane.b32.xlu1 %v103_v1, %s132_s11  ;;  %v104_v3 = vld [vmem:[%s207_s0 + $0xc] sm:$0x1]   ;;  %s133_s16 = smov 56   ;;  %s134_s17 = smov 48   ;;  %v105_v4 = vld [vmem:[%s207_s0 + $0xb] sm:$0x1]  }
   0x3   :  { %v106_v5 = vld [vmem:[%s207_s0 + $0xa] sm:$0x1]   ;;  %v2_v6 = vld [vmem:[%s207_s0] sm:$0x1]   ;;  %s135_s24 = smov 44   ;;  %s136_s25 = smov 40  }
   0x4   :  { %4 = vst.msk [vmem:[#allocation0] sm:$0x1] %vm3_vm0, %v2_v6   ;;  %v107_v7 = vld [vmem:[%s207_s0 + $0x9] sm:$0x1]   ;;  %v108_v8 = vld [vmem:[%s207_s0 + $0x8] sm:$0x1]  }
   0x5   :  { %s137_s30 = smov 36   ;;  %s138_s2 = smov 32   ;;  %v109_v9 = vld [vmem:[%s207_s0 + $0x7] sm:$0x1]   ;;  %v110_v10 = vld [vmem:[%s207_s0 + $0x6] sm:$0x1]  }
   0x6   :  { %13 = vrot.lane.b32.xlu0 %v102_v2, %s133_s16  ;;  %25 = vrot.lane.b32.xlu1 %v104_v3, %s134_s17  ;;  %s139_s7 = smov 28   ;;  %s140_s8 = smov 24   ;;  %v111_v11 = vld [vmem:[%s207_s0 + $0x5] sm:$0x1]   ;;  %v112_v12 = vld [vmem:[%s207_s0 + $0x4] sm:$0x1]  }
   0x7   :  { %s141_s13 = smov 20   ;;  %s142_s14 = smov 16   ;;  %v113_v13 = vld [vmem:[%s207_s0 + $0x3] sm:$0x1]   ;;  %v114_v14 = vld [vmem:[%s207_s0 + $0x2] sm:$0x1]  }
   0x8   :  { %s143_s19 = smov 12   ;;  %s144_s20 = smov 8   ;;  %v115_v15 = vld [vmem:[%s207_s0 + $0x1] sm:$0x1]   ;;  %vm27_vm4 = vcmask 425344   ;;  %vm33_vm5 = vcmask 392544  }
   0x9   :  { %s145_s0 = smov 4   ;;  %vm39_vm6 = vcmask 359744   ;;  %vm45_vm7 = vcmask 326944   ;;  %vm51_vm8 = vcmask 294144   ;;  %vm57_vm9 = vcmask 261344  }
   0xa   :  { %31 = vrot.lane.b32.xlu0 %v105_v4, %s135_s24  ;;  %37 = vrot.lane.b32.xlu1 %v106_v5, %s136_s25  ;;  %vm63_vm10 = vcmask 228544   ;;  %vm69_vm11 = vcmask 195744   ;;  %vm75_vm12 = vcmask 162944   ;;  %vm81_vm13 = vcmask 130144  }
   0xb   :  { %vm87_vm14 = vcmask 97344   ;;  %vm93_vm15 = vcmask 64544  }
   0xe   :  { %43 = vrot.lane.b32.xlu0 %v107_v7, %s137_s30  ;;  %49 = vrot.lane.b32.xlu1 %v108_v8, %s138_s2 }
  0x12   :  { %55 = vrot.lane.b32.xlu0 %v109_v9, %s139_s7  ;;  %61 = vrot.lane.b32.xlu1 %v110_v10, %s140_s8 }
  0x16   :  { %67 = vrot.lane.b32.xlu0 %v111_v11, %s141_s13  ;;  %73 = vrot.lane.b32.xlu1 %v112_v12, %s142_s14 }
  0x1a   :  { %79 = vrot.lane.b32.xlu0 %v113_v13, %s143_s19  ;;  %85 = vrot.lane.b32.xlu1 %v114_v14, %s144_s20 }
  0x1e   :  { %91 = vrot.lane.b32.xlu0 %v115_v15, %s145_s0 }
  0x74   :  { %v8_v16 = vpop.permute.xlu0 %7   ;;  %v20_v17 = vpop.permute.xlu1 %19  }
  0x75   :  { %10 = vst.msk [vmem:[#allocation0] sm:$0x1] %vm9_vm1, %v8_v16  }
  0x78   :  { %v14_v18 = vpop.permute.xlu0 %13   ;;  %v26_v19 = vpop.permute.xlu1 %25  }
  0x79   :  { %16 = vst.msk [vmem:[#allocation0] sm:$0x1] %vm15_vm2, %v14_v18  }
  0x7a   :  { %22 = vst.msk [vmem:[#allocation0] sm:$0x1] %vm21_vm3, %v20_v17  }
  0x7b   :  { %28 = vst.msk [vmem:[#allocation0] sm:$0x1] %vm27_vm4, %v26_v19  }
  0x7c   :  { %v32_v20 = vpop.permute.xlu0 %31   ;;  %v38_v21 = vpop.permute.xlu1 %37  }
  0x7d   :  { %34 = vst.msk [vmem:[#allocation0] sm:$0x1] %vm33_vm5, %v32_v20  }
  0x7e   :  { %40 = vst.msk [vmem:[#allocation0] sm:$0x1] %vm39_vm6, %v38_v21  }
  0x80   :  { %v44_v22 = vpop.permute.xlu0 %43   ;;  %v50_v23 = vpop.permute.xlu1 %49  }
  0x81   :  { %46 = vst.msk [vmem:[#allocation0] sm:$0x1] %vm45_vm7, %v44_v22  }
  0x82   :  { %52 = vst.msk [vmem:[#allocation0] sm:$0x1] %vm51_vm8, %v50_v23  }
  0x84   :  { %v56_v24 = vpop.permute.xlu0 %55   ;;  %v62_v25 = vpop.permute.xlu1 %61  }
  0x85   :  { %58 = vst.msk [vmem:[#allocation0] sm:$0x1] %vm57_vm9, %v56_v24  }
  0x86   :  { %64 = vst.msk [vmem:[#allocation0] sm:$0x1] %vm63_vm10, %v62_v25  }
  0x88   :  { %v68_v26 = vpop.permute.xlu0 %67   ;;  %v74_v27 = vpop.permute.xlu1 %73  }
  0x89   :  { %70 = vst.msk [vmem:[#allocation0] sm:$0x1] %vm69_vm11, %v68_v26  }
  0x8a   :  { %76 = vst.msk [vmem:[#allocation0] sm:$0x1] %vm75_vm12, %v74_v27  }
  0x8c   :  { %v80_v28 = vpop.permute.xlu0 %79   ;;  %v86_v29 = vpop.permute.xlu1 %85  }
  0x8d   :  { %82 = vst.msk [vmem:[#allocation0] sm:$0x1] %vm81_vm13, %v80_v28  }
  0x8e   :  { %88 = vst.msk [vmem:[#allocation0] sm:$0x1] %vm87_vm14, %v86_v29  }
  0x90   :  { %v92_v30 = vpop.permute.xlu0 %91  }
  0x91   :  { %94 = vst.msk [vmem:[#allocation0] sm:$0x1] %vm93_vm15, %v92_v30  }
  0x98   :  { %v98_v31 = vld [vmem:[#allocation0] sm:$0x1] }
  0x99   :  { %100 = vst [vmem:[%s208_s1] sm:$0x1] %v98_v31 }

// kernel: pseudo_conv3d.2
= control target key start
LH: loop header
LB: loop body
LE: loop exit
PB: predicated region body
PF: predicated region fallthrough
CT: control target
= control target key end

     0   :  { %s1358_s12 = smov 0   ;;  %s1625_s0 = inlined_call_operand.vmem [shape: f32[16,18,72], index: 0, kind: input, shape index: {}]   ;;  %s1626_s1 = inlined_call_operand.vmem [shape: f32[3,72,64], index: 1, kind: input, shape index: {}]   ;;  %s1627_s2 = inlined_call_operand.vmem [shape: f32[1,64], index: 2, kind: input, shape index: {}]   ;;  %s1628_s3 = inlined_call_operand.vmem [shape: f32[16,16,64], index: 3, kind: output, shape index: {}]  }
   0x1 LB: > { %s950_s13 = sadd.s32 4294967295, %s1336_s12   ;;  %p954_p0 = scmp.ge.s32.totalorder %s1336_s12, 1  ;;  %s1336_s12 = sphi %s1358_s12, %s13_s12  }
   0x2   : > { %p139_p1 = scmp.lt.s32.totalorder %s1336_s12, 3 }
   0x4   : > { %p140_p2 = pnand %p954_p0, %p139_p1 }
   0x5   : > { %v960_v0 = vld [vmem:[%s1626_s1 + $0x48] sm:$0xff] (!%p140_p2)  ;;  %v961_v1 = vld [vmem:[%s1626_s1 + $0x50] sm:$0xff] (!%p140_p2)  ;;  %v195_v2 = vld [vmem:[%s1626_s1] sm:$0xff] (!%p140_p2)  ;;  %s955_s20 = sshll.u32 (!%p140_p2), %s950_s13, 3  ;;  %vm230_vm0 = vcmask (!%p140_p2), 588800   ;;  %vm875_vm1 = vcmask (!%p140_p2), 523264  }
   0x6   : > { %143 = sbr.rel (%p140_p2) target bundleno = 289 (0x121), region = 32  ;;  %v1231_v3 = vpack.c.bf16 (!%p140_p2), %v961_v1, %v960_v0  ;;  %v196_v4 = vld [vmem:[%s1626_s1 + $0x8] sm:$0xff] (!%p140_p2)  ;;  %v962_v5 = vld [vmem:[%s1626_s1 + $0x58] sm:$0xff] (!%p140_p2)  ;;  %v963_v6 = vld [vmem:[%s1626_s1 + $0x60] sm:$0xff] (!%p140_p2)  ;;  %p166_p3 = scmp.lt.s32.totalorder (!%p140_p2), %s955_s20, 15 }
   0x7   : > { %v1247_v7 = vpack.c.bf16 (!%p140_p2), %v196_v4, %v195_v2  ;;  %v1235_v8 = vpack.c.bf16 (!%p140_p2), %v963_v6, %v962_v5  ;;  %v197_v9 = vld [vmem:[%s1626_s1 + $0x10] sm:$0xff] (!%p140_p2)  ;;  %v198_v10 = vld [vmem:[%s1626_s1 + $0x18] sm:$0xff] (!%p140_p2)  ;;  %v964_v11 = vld [vmem:[%s1626_s1 + $0x68] sm:$0xff] (!%p140_p2) }
   0x8   : > { %1232 = vmatprep.subr.bf16.mxu1 (!%p140_p2), %v1231_v3  ;;  %v1251_v12 = vpack.c.bf16 (!%p140_p2), %v198_v10, %v197_v9  ;;  %v965_v13 = vld [vmem:[%s1626_s1 + $0x70] sm:$0xff] (!%p140_p2)  ;;  %v199_v14 = vld [vmem:[%s1626_s1 + $0x20] sm:$0xff] (!%p140_p2)  ;;  %v200_v15 = vld [vmem:[%s1626_s1 + $0x28] sm:$0xff] (!%p140_p2) }
   0x9   : > { %1248 = vmatprep.subr.bf16.mxu0 (!%p140_p2), %v1247_v7  ;;  %1234 = vmatpush3.bf16.msra.mxu1 (!%p140_p2), %v1231_v3  ;;  %v1239_v16 = vpack.c.bf16 (!%p140_p2), %v965_v13, %v964_v11  ;;  %v1255_v17 = vpack.c.bf16 (!%p140_p2), %v200_v15, %v199_v14  ;;  %v966_v18 = vld [vmem:[%s1626_s1 + $0x78] sm:$0xff] (!%p140_p2)  ;;  %v967_v19 = vld [vmem:[%s1626_s1 + $0x80] sm:$0xff] (!%p140_p2)  ;;  %v201_v20 = vld [vmem:[%s1626_s1 + $0x30] sm:$0xff] (!%p140_p2) }
   0xa   : > { %1250 = vmatpush3.bf16.msra.mxu0 (!%p140_p2), %v1247_v7  ;;  %1236 = vmatprep.subr.bf16.mxu1 (!%p140_p2), %v1235_v8  ;;  %v202_v21 = vld [vmem:[%s1626_s1 + $0x38] sm:$0xff] (!%p140_p2)  ;;  %v1243_v24 = vpack.c.bf16 (!%p140_p2), %v967_v19, %v966_v18  ;;  %v968_v26 = vld [vmem:[%s1626_s1 + $0x88] sm:$0xff] (!%p140_p2)  ;;  %v203_v27 = vld [vmem:[%s1626_s1 + $0x40] sm:$0xff] (!%p140_p2) }
   0xb   : > { %1252 = vmatprep.subr.bf16.mxu0 (!%p140_p2), %v1251_v12  ;;  %v1259_v25 = vpack.c.bf16 (!%p140_p2), %v202_v21, %v201_v20  ;;  %v1001_v28 = vld [vmem:[%s1626_s1 + $0x90] sm:$0xff] (!%p140_p2)  ;;  %v1002_v29 = vld [vmem:[%s1626_s1 + $0x98] sm:$0xff] (!%p140_p2)  ;;  %v1003_v33 = vld [vmem:[%s1626_s1 + $0xa0] sm:$0xff] (!%p140_p2) }
   0xc   : > { %v1263_v31 = vpack.c.bf16 (!%p140_p2), %v1002_v29, %v1001_v28  ;;  %v1004_v34 = vld [vmem:[%s1626_s1 + $0xa8] sm:$0xff] (!%p140_p2)  ;;  %v1005_v36 = vld [vmem:[%s1626_s1 + $0xb0] sm:$0xff] (!%p140_p2)  ;;  %v1006_v39 = vld [vmem:[%s1626_s1 + $0xb8] sm:$0xff] (!%p140_p2) }
   0xd   : > { %s1630_s20 = smov (!%p166_p3, %s955_s20), 15  ;;  %1238 = vmatpush3.bf16.msra.mxu1 %v1235_v8  ;;  %v1267_v42 = vpack.c.bf16 %v1004_v34, %v1003_v33  ;;  %v1271_v44 = vpack.c.bf16 %v1006_v39, %v1005_v36  ;;  %v1007_v46 = vld [vmem:[%s1626_s1 + $0xc0] sm:$0xff]  ;;  %v1008_v47 = vld [vmem:[%s1626_s1 + $0xc8] sm:$0xff]  ;;  %v1009_v57 = vld [vmem:[%s1626_s1 + $0xd0] sm:$0xff] }
   0xe   : > { %s1321_s13 = smul.u32 24, %s1630_s20  ;;  %1254 = vmatpush3.bf16.msra.mxu0 %v1251_v12  ;;  %1240 = vmatprep.subr.bf16.mxu1 %v1239_v16  ;;  %v1275_v51 = vpack.c.bf16 %v1008_v47, %v1007_v46  ;;  %s1029_s23 = sshll.u32 %s1630_s20, 4 }
   0xf   : > { %1256 = vmatprep.subr.bf16.mxu0 %v1255_v17  ;;  %s1568_s28 = scalar_lea.vmem %s1628_s3, %s1029_s23 }
  0x10   : > { %s1420_s25 = scalar_lea.vmem %s1625_s0, %s1321_s13 }
  0x11   : > { %v204_v22 = vld [vmem:[%s1420_s25 + $0x1] sm:$0xff]  ;;  %1242 = vmatpush3.bf16.msra.mxu1 %v1239_v16  ;;  %v205_v30 = vld [vmem:[%s1420_s25 + $0x9] sm:$0xff]  ;;  %v206_v35 = vld [vmem:[%s1420_s25 + $0x19] sm:$0xff] }
  0x12   : > { %v179_v23 = vld [vmem:[%s1420_s25] sm:$0xff]  ;;  %1123 = vmatprep.mubr.msk.f32.mxu1 %vm230_vm0, %v204_v22  ;;  %1258 = vmatpush3.bf16.msra.mxu0 %v1255_v17  ;;  %v180_v32 = vld [vmem:[%s1420_s25 + $0x8] sm:$0xff]  ;;  %v181_v37 = vld [vmem:[%s1420_s25 + $0x18] sm:$0xff] }
  0x13   : > { %1165 = vmatprep.mubr.msk.f32.mxu0 %vm230_vm0, %v179_v23  ;;  %1244 = vmatprep.subr.bf16.mxu1 %v1243_v24  ;;  %v207_v38 = vld [vmem:[%s1420_s25 + $0x21] sm:$0xff]  ;;  %v208_v41 = vld [vmem:[%s1420_s25 + $0x31] sm:$0xff]  ;;  %v209_v45 = vld [vmem:[%s1420_s25 + $0x39] sm:$0xff] }
  0x14   : > { %1260 = vmatprep.subr.bf16.mxu0 %v1259_v25  ;;  %v182_v40 = vld [vmem:[%s1420_s25 + $0x20] sm:$0xff]  ;;  %v183_v43 = vld [vmem:[%s1420_s25 + $0x30] sm:$0xff]  ;;  %v184_v48 = vld [vmem:[%s1420_s25 + $0x38] sm:$0xff] }
  0x15   : > { %1246 = vmatpush3.bf16.msra.mxu1 %v1243_v24  ;;  %v210_v49 = vld [vmem:[%s1420_s25 + $0x49] sm:$0xff]  ;;  %v211_v52 = vld [vmem:[%s1420_s25 + $0x51] sm:$0xff]  ;;  %v212_v54 = vld [vmem:[%s1420_s25 + $0x61] sm:$0xff] }
  0x16   : > { %1262 = vmatpush3.bf16.msra.mxu0 %v1259_v25  ;;  %1121 = vmatprep.subr.mxu1 %v968_v26  ;;  %v185_v50 = vld [vmem:[%s1420_s25 + $0x48] sm:$0xff]  ;;  %v186_v53 = vld [vmem:[%s1420_s25 + $0x50] sm:$0xff]  ;;  %v187_v55 = vld [vmem:[%s1420_s25 + $0x60] sm:$0xff] }
  0x17   : > { %1163 = vmatprep.subr.mxu0 %v203_v27  ;;  %v213_v56 = vld [vmem:[%s1420_s25 + $0x69] sm:$0xff]  ;;  %v214_v59 = vld [vmem:[%s1420_s25 + $0x79] sm:$0xff]  ;;  %v215_v61 = vld [vmem:[%s1420_s25 + $0x81] sm:$0xff] }
  0x18   : > { %v188_v58 = vld [vmem:[%s1420_s25 + $0x68] sm:$0xff]  ;;  %v189_v60 = vld [vmem:[%s1420_s25 + $0x78] sm:$0xff]  ;;  %v190_v62 = vld [vmem:[%s1420_s25 + $0x80] sm:$0xff] }
  0x19   : > { %1122 = vmatpush3.msra.mxu1 %v968_v26  ;;  %v216_v63 = vld [vmem:[%s1420_s25 + $0x91] sm:$0xff]  ;;  %v217_v1 = vld [vmem:[%s1420_s25 + $0x99] sm:$0xff]  ;;  %v218_v3 = vld [vmem:[%s1420_s25 + $0xa9] sm:$0xff] }
  0x1a   : > { %1164 = vmatpush3.msra.mxu0 %v203_v27  ;;  %1124 = vmatmul.mubr.msk.f32.vlgmr.msra.gmra.mrb[0].mxu1 %vm230_vm0, %v205_v30  ;;  %v191_v0 = vld [vmem:[%s1420_s25 + $0x90] sm:$0xff]  ;;  %v192_v2 = vld [vmem:[%s1420_s25 + $0x98] sm:$0xff]  ;;  %v193_v4 = vld [vmem:[%s1420_s25 + $0xa8] sm:$0xff] }
  0x1b   : > { %1166 = vmatmul.mubr.msk.f32.vlgmr.msra.gmra.mrb[0].mxu0 %vm230_vm0, %v180_v32  ;;  %1264 = vmatprep.subr.bf16.mxu0 %v1263_v31  ;;  %v219_v5 = vld [vmem:[%s1420_s25 + $0xb1] sm:$0xff]  ;;  %v625_v7 = vld [vmem:[%s1420_s25 + $0x62] sm:$0xff]  ;;  %v627_v11 = vld [vmem:[%s1420_s25 + $0x7a] sm:$0xff] }
  0x1c   : > { %1279 = vmatprep.subr.bf16.mxu1 %v1263_v31  ;;  %1266 = vmatpush3.bf16.msra.mxu0 %v1263_v31  ;;  %v194_v6 = vld [vmem:[%s1420_s25 + $0xb0] sm:$0xff]  ;;  %v617_v8 = vld [vmem:[%s1420_s25 + $0x2] sm:$0xff]  ;;  %v619_v12 = vld [vmem:[%s1420_s25 + $0x1a] sm:$0xff] }
  0x1d   : > { %1284 = vmatpush3.bf16.msra.mxu1 %v1263_v31  ;;  %1126 = vmatprep.mubr.msk.f32.mxu1 %vm230_vm0, %v206_v35  ;;  %v626_v9 = vld [vmem:[%s1420_s25 + $0x6a] sm:$0xff]  ;;  %v628_v13 = vld [vmem:[%s1420_s25 + $0x82] sm:$0xff]  ;;  %v629_v15 = vld [vmem:[%s1420_s25 + $0x92] sm:$0xff] }
  0x1e   : > { %1168 = vmatprep.mubr.msk.f32.mxu0 %vm230_vm0, %v181_v37  ;;  %1127 = vmatmul.mubr.msk.f32.gmra.mrb[2].mxu1 %vm230_vm0, %v207_v38  ;;  %v618_v10 = vld [vmem:[%s1420_s25 + $0xa] sm:$0xff]  ;;  %v620_v14 = vld [vmem:[%s1420_s25 + $0x22] sm:$0xff]  ;;  %v621_v16 = vld [vmem:[%s1420_s25 + $0x32] sm:$0xff] }
  0x1f   : > { %1169 = vmatmul.mubr.msk.f32.gmra.mrb[2].mxu0 %vm230_vm0, %v182_v40  ;;  %1129 = vmatprep.mubr.msk.f32.mxu1 %vm230_vm0, %v208_v41  ;;  %v630_v17 = vld [vmem:[%s1420_s25 + $0x9a] sm:$0xff]  ;;  %v631_v19 = vld [vmem:[%s1420_s25 + $0xaa] sm:$0xff]  ;;  %v632_v21 = vld [vmem:[%s1420_s25 + $0xb2] sm:$0xff] }
  0x20   : > { %1171 = vmatprep.mubr.msk.f32.mxu0 %vm230_vm0, %v183_v43  ;;  %1268 = vmatprep.subr.bf16.mxu0 %v1267_v42  ;;  %v622_v18 = vld [vmem:[%s1420_s25 + $0x3a] sm:$0xff]  ;;  %v623_v20 = vld [vmem:[%s1420_s25 + $0x4a] sm:$0xff]  ;;  %v624_v22 = vld [vmem:[%s1420_s25 + $0x52] sm:$0xff] }
  0x21   : > { %1280 = vmatprep.subr.bf16.mxu1 %v1267_v42  ;;  %1270 = vmatpush3.bf16.msra.mxu0 %v1267_v42 }
  0x22   : > { %1130 = vmatmul.mubr.msk.f32.gmra.mrb[4].mxu1 %vm230_vm0, %v209_v45  ;;  %1272 = vmatprep.subr.bf16.mxu0 %v1271_v44 }
  0x23   : > { %1172 = vmatmul.mubr.msk.f32.gmra.mrb[4].mxu0 %vm230_vm0, %v184_v48  ;;  %1285 = vmatpush3.bf16.msra.mxu1 %v1267_v42 }
  0x24   : > { %1132 = vmatprep.mubr.msk.f32.mxu1 %vm230_vm0, %v210_v49  ;;  %1174 = vmatprep.mubr.msk.f32.mxu0 %vm230_vm0, %v185_v50 }
  0x25   : > { %1281 = vmatprep.subr.bf16.mxu1 %v1271_v44  ;;  %1274 = vmatpush3.bf16.msra.mxu0 %v1271_v44 }
  0x26   : > { %1133 = vmatmul.mubr.msk.f32.gmra.mrb[6].mxu1 %vm230_vm0, %v211_v52  ;;  %1276 = vmatprep.subr.bf16.mxu0 %v1275_v51 }
  0x27   : > { %1175 = vmatmul.mubr.msk.f32.gmra.mrb[6].mxu0 %vm230_vm0, %v186_v53  ;;  %1286 = vmatpush3.bf16.msra.mxu1 %v1271_v44 }
  0x28   : > { %1135 = vmatprep.mubr.msk.f32.mxu1 %vm230_vm0, %v212_v54  ;;  %1177 = vmatprep.mubr.msk.f32.mxu0 %vm230_vm0, %v187_v55  ;;  %v1563_v55 = vld [vmem:[%s1627_s2] ss:$0 sm:$0xff] }
  0x29   : > { %1282 = vmatprep.subr.bf16.mxu1 %v1275_v51  ;;  %1278 = vmatpush3.bf16.msra.mxu0 %v1275_v51 }
  0x2a   : > { %1136 = vmatmul.mubr.msk.f32.gmra.mrb[8].mxu1 %vm230_vm0, %v213_v56  ;;  %1205 = vmatprep.subr.mxu0 %v1009_v57 }
  0x2b   : > { %1178 = vmatmul.mubr.msk.f32.gmra.mrb[8].mxu0 %vm230_vm0, %v188_v58  ;;  %1138 = vmatprep.mubr.msk.f32.mxu1 %vm230_vm0, %v214_v59 }
  0x2c   : > { %1180 = vmatprep.mubr.msk.f32.mxu0 %vm230_vm0, %v189_v60  ;;  %1287 = vmatpush3.bf16.msra.mxu1 %v1275_v51 }
  0x2d   : > { %1283 = vmatprep.subr.mxu1 %v1009_v57  ;;  %1206 = vmatpush3.msra.mxu0 %v1009_v57 }
  0x2e   : > { %1139 = vmatmul.mubr.msk.f32.gmra.mrb[10].mxu1 %vm230_vm0, %v215_v61 }
  0x2f   : > { %1181 = vmatmul.mubr.msk.f32.gmra.mrb[10].mxu0 %vm230_vm0, %v190_v62  ;;  %1141 = vmatprep.mubr.msk.f32.mxu1 %vm230_vm0, %v216_v63 }
  0x30   : > { %1183 = vmatprep.mubr.msk.f32.mxu0 %vm230_vm0, %v191_v0  ;;  %1288 = vmatpush3.msra.mxu1 %v1009_v57 }
  0x32   : > { %1142 = vmatmul.mubr.msk.f32.gmra.mrb[12].mxu1 %vm230_vm0, %v217_v1 }
  0x33   : > { %1184 = vmatmul.mubr.msk.f32.gmra.mrb[12].mxu0 %vm230_vm0, %v192_v2  ;;  %1144 = vmatprep.mubr.msk.f32.mxu1 %vm230_vm0, %v218_v3 }
  0x34   : > { %1186 = vmatprep.mubr.msk.f32.mxu0 %vm230_vm0, %v193_v4 }
  0x36   : > { %1145 = vmatmul.mubr.msk.f32.gmra.mrb[14].mxu1 %vm230_vm0, %v219_v5 }
  0x37   : > { %1187 = vmatmul.mubr.msk.f32.gmra.mrb[14].mxu0 %vm230_vm0, %v194_v6  ;;  %1219 = vmatprep.mubr.msk.f32.mxu1 %vm230_vm0, %v625_v7 }
  0x38   : > { %1207 = vmatprep.mubr.msk.f32.mxu0 %vm230_vm0, %v617_v8 }
  0x3a   : > { %1220 = vmatmul.mubr.msk.f32.vlgmr.msra.gmra.mrb[16].mxu1 %vm230_vm0, %v626_v9 }
  0x3b   : > { %1208 = vmatmul.mubr.msk.f32.vlgmr.msra.gmra.mrb[0].mxu0 %vm230_vm0, %v618_v10  ;;  %1222 = vmatprep.mubr.msk.f32.mxu1 %vm230_vm0, %v627_v11 }
  0x3c   : > { %1210 = vmatprep.mubr.msk.f32.mxu0 %vm230_vm0, %v619_v12 }
  0x3e   : > { %1223 = vmatmul.mubr.msk.f32.gmra.mrb[18].mxu1 %vm230_vm0, %v628_v13 }
  0x3f   : > { %1211 = vmatmul.mubr.msk.f32.gmra.mrb[2].mxu0 %vm230_vm0, %v620_v14  ;;  %1225 = vmatprep.mubr.msk.f32.mxu1 %vm230_vm0, %v629_v15 }
  0x40   : > { %1213 = vmatprep.mubr.msk.f32.mxu0 %vm230_vm0, %v621_v16 }
  0x42   : > { %1226 = vmatmul.mubr.msk.f32.gmra.mrb[20].mxu1 %vm230_vm0, %v630_v17 }
  0x43   : > { %1214 = vmatmul.mubr.msk.f32.gmra.mrb[4].mxu0 %vm230_vm0, %v622_v18  ;;  %1228 = vmatprep.mubr.msk.f32.mxu1 %vm230_vm0, %v631_v19 }
  0x44   : > { %1216 = vmatprep.mubr.msk.f32.mxu0 %vm230_vm0, %v623_v20 }
  0x46   : > { %1229 = vmatmul.mubr.msk.f32.gmra.mrb[22].mxu1 %vm230_vm0, %v632_v21 }
  0x47   : > { %1217 = vmatmul.mubr.msk.f32.gmra.mrb[6].mxu0 %vm230_vm0, %v624_v22 }
  0xed   : > { %v1125_v23 = vpop.f32.mrb[0].mxu1 }
  0xee   : > { %v345_v24 = vpop.f32.mrb[1].mxu1 }
  0xf1   : > { %v1128_v25 = vpop.f32.mrb[2].mxu1 }
  0xf2   : > { %v355_v26 = vpop.f32.mrb[3].mxu1 }
  0xf5   : > { %v1551_v27 = vpop.f32.mrb[4].mxu1 }
  0xf6   : > { %v1553_v28 = vpop.f32.mrb[5].mxu1 }
  0xf9   : > { %v1555_v29 = vpop.f32.mrb[6].mxu1 }
  0xfa   : > { %v1557_v30 = vpop.f32.mrb[7].mxu1 }
  0xfd   : > { %v1137_v31 = vpop.f32.mrb[8].mxu1 }
  0xfe   : > { %v1179_v32 = vpop.f32.mrb[8].mxu0  ;;  %v385_v33 = vpop.f32.mrb[9].mxu1 }
  0xff   : > { %v584_v34 = vadd.f32 %v1179_v32, %v1137_v31  ;;  %v578_v35 = vpop.f32.mrb[9].mxu0 }
 0x100   : > { %v579_v36 = vadd.f32 %v578_v35, %v385_v33 }
 0x101   : > { %v1140_v37 = vpop.f32.mrb[10].mxu1 }
 0x102   : > { %v1182_v38 = vpop.f32.mrb[10].mxu0  ;;  %v395_v39 = vpop.f32.mrb[11].mxu1 }
 0x103   : > { %v594_v40 = vadd.f32 %v1182_v38, %v1140_v37  ;;  %v588_v41 = vpop.f32.mrb[11].mxu0 }
 0x104   : > { %v589_v42 = vadd.f32 %v588_v41, %v395_v39 }
 0x105   : > { %v1143_v43 = vpop.f32.mrb[12].mxu1 }
 0x106   : > { %v1185_v44 = vpop.f32.mrb[12].mxu0  ;;  %v405_v45 = vpop.f32.mrb[13].mxu1 }
 0x107   : > { %v604_v46 = vadd.f32 %v1185_v44, %v1143_v43  ;;  %v598_v47 = vpop.f32.mrb[13].mxu0 }
 0x108   : > { %v599_v48 = vadd.f32 %v598_v47, %v405_v45 }
 0x109   : > { %v1146_v49 = vpop.f32.mrb[14].mxu1 }
 0x10a   : > { %v1188_v50 = vpop.f32.mrb[14].mxu0  ;;  %v415_v51 = vpop.f32.mrb[15].mxu1 }
 0x10b   : > { %v614_v52 = vadd.f32 %v1188_v50, %v1146_v49  ;;  %v608_v53 = vpop.f32.mrb[15].mxu0 }
 0x10c   : > { %v609_v54 = vadd.f32 %v608_v53, %v415_v51 }
 0x10d   : > { %v1221_v56 = vpop.f32.mrb[16].mxu1 }
 0x10e   : > { %v1209_v57 = vpop.f32.mrb[0].mxu0  ;;  %v845_v58 = vadd.f32 %v1221_v56, %v584_v34  ;;  %v797_v59 = vpop.f32.mrb[17].mxu1 }
 0x10f   : > { %v1289_v60 = vadd.f32 %v1209_v57, %v1125_v23  ;;  %v757_v61 = vpop.f32.mrb[1].mxu0  ;;  %v844_v62 = vadd.f32 %v797_v59, %v579_v36 }
 0x110   : > { %v868_v63 = vadd.f32 %v1563_v55, %v845_v58  ;;  %v1290_v0 = vadd.f32 %v757_v61, %v345_v24 }
 0x111   : > { %v860_v1 = vadd.f32 %v1289_v60, %v1563_v55  ;;  %v867_v2 = vadd.f32 %v1563_v55, %v844_v62  ;;  %v1224_v3 = vpop.f32.mrb[18].mxu1 }
 0x112   : > { %885 = vst.msk [vmem:[%s1568_s28 + $0x48] sm:$0xff] %vm875_vm1, %v868_v63  ;;  %v859_v4 = vadd.f32 %v1290_v0, %v1563_v55  ;;  %v1212_v5 = vpop.f32.mrb[2].mxu0  ;;  %v847_v6 = vadd.f32 %v1224_v3, %v594_v40  ;;  %v807_v7 = vpop.f32.mrb[19].mxu1 }
 0x113   : > { %877 = vst.msk [vmem:[%s1568_s28 + $0x8] sm:$0xff] %vm875_vm1, %v860_v1  ;;  %884 = vst.msk [vmem:[%s1568_s28 + $0x40] sm:$0xff] %vm875_vm1, %v867_v2  ;;  %v1291_v8 = vadd.f32 %v1212_v5, %v1128_v25  ;;  %v767_v9 = vpop.f32.mrb[3].mxu0  ;;  %v846_v10 = vadd.f32 %v807_v7, %v589_v42 }
 0x114   : > { %876 = vst.msk [vmem:[%s1568_s28] sm:$0xff] %vm875_vm1, %v859_v4  ;;  %v870_v11 = vadd.f32 %v1563_v55, %v847_v6  ;;  %v1292_v12 = vadd.f32 %v767_v9, %v355_v26 }
 0x115   : > { %v862_v13 = vadd.f32 %v1291_v8, %v1563_v55  ;;  %v869_v14 = vadd.f32 %v1563_v55, %v846_v10  ;;  %v1227_v15 = vpop.f32.mrb[20].mxu1 }
 0x116   : > { %887 = vst.msk [vmem:[%s1568_s28 + $0x58] sm:$0xff] %vm875_vm1, %v870_v11  ;;  %v861_v16 = vadd.f32 %v1292_v12, %v1563_v55  ;;  %v1215_v17 = vpop.f32.mrb[4].mxu0  ;;  %v849_v18 = vadd.f32 %v1227_v15, %v604_v46  ;;  %v817_v19 = vpop.f32.mrb[21].mxu1 }
 0x117   : > { %879 = vst.msk [vmem:[%s1568_s28 + $0x18] sm:$0xff] %vm875_vm1, %v862_v13  ;;  %886 = vst.msk [vmem:[%s1568_s28 + $0x50] sm:$0xff] %vm875_vm1, %v869_v14  ;;  %v1293_v20 = vadd.f32 %v1215_v17, %v1551_v27  ;;  %v777_v21 = vpop.f32.mrb[5].mxu0  ;;  %v848_v22 = vadd.f32 %v817_v19, %v599_v48 }
 0x118   : > { %878 = vst.msk [vmem:[%s1568_s28 + $0x10] sm:$0xff] %vm875_vm1, %v861_v16  ;;  %v872_v23 = vadd.f32 %v1563_v55, %v849_v18  ;;  %v1294_v24 = vadd.f32 %v777_v21, %v1553_v28 }
 0x119   : > { %v864_v25 = vadd.f32 %v1293_v20, %v1563_v55  ;;  %v871_v26 = vadd.f32 %v1563_v55, %v848_v22  ;;  %v1230_v31 = vpop.f32.mrb[22].mxu1 }
 0x11a   : > { %889 = vst.msk [vmem:[%s1568_s28 + $0x68] sm:$0xff] %vm875_vm1, %v872_v23  ;;  %v863_v32 = vadd.f32 %v1294_v24, %v1563_v55  ;;  %v1218_v27 = vpop.f32.mrb[6].mxu0  ;;  %v851_v33 = vadd.f32 %v1230_v31, %v614_v52  ;;  %v827_v34 = vpop.f32.mrb[23].mxu1 }
 0x11b   : > { %881 = vst.msk [vmem:[%s1568_s28 + $0x28] sm:$0xff] %vm875_vm1, %v864_v25  ;;  %888 = vst.msk [vmem:[%s1568_s28 + $0x60] sm:$0xff] %vm875_vm1, %v871_v26  ;;  %v1295_v28 = vadd.f32 %v1218_v27, %v1555_v29  ;;  %v787_v35 = vpop.f32.mrb[7].mxu0  ;;  %v850_v36 = vadd.f32 %v827_v34, %v609_v54 }
 0x11c   : > { %880 = vst.msk [vmem:[%s1568_s28 + $0x20] sm:$0xff] %vm875_vm1, %v863_v32  ;;  %v874_v37 = vadd.f32 %v1563_v55, %v851_v33  ;;  %v1296_v38 = vadd.f32 %v787_v35, %v1557_v30 }
 0x11d   : > { %v866_v39 = vadd.f32 %v1295_v28, %v1563_v55  ;;  %v873_v40 = vadd.f32 %v1563_v55, %v850_v36 }
 0x11e   : > { %891 = vst.msk [vmem:[%s1568_s28 + $0x78] sm:$0xff] %vm875_vm1, %v874_v37  ;;  %v865_v41 = vadd.f32 %v1296_v38, %v1563_v55 }
 0x11f   : > { %883 = vst.msk [vmem:[%s1568_s28 + $0x38] sm:$0xff] %vm875_vm1, %v866_v39  ;;  %890 = vst.msk [vmem:[%s1568_s28 + $0x70] sm:$0xff] %vm875_vm1, %v873_v40 }
 0x120   : > { %882 = vst.msk [vmem:[%s1568_s28 + $0x30] sm:$0xff] %vm875_vm1, %v865_v41 }
 0x121 PF: > { %s13_s12 = sadd.s32 1, %s1336_s12  }
 0x122   : > { %p10_p4 = scmp.ge.s32.totalorder %s13_s12, 4  }
 0x124   :  { %12 = sbr.rel (!%p10_p4) target bundleno = 1 (0x1), region = 64 }

// kernel: pseudo_conv3d.3
= control target key start
LH: loop header
LB: loop body
LE: loop exit
PB: predicated region body
PF: predicated region fallthrough
CT: control target
= control target key end

     0   :  { %s1305_s12 = smov 0   ;;  %s1307_s13 = smov 0   ;;  %s1544_s0 = inlined_call_operand.vmem [shape: f32[2,8,16,64], index: 0, kind: input, shape index: {}]   ;;  %s1545_s1 = inlined_call_operand.vmem [shape: f32[3,64,64], index: 1, kind: input, shape index: {}]   ;;  %s1546_s2 = inlined_call_operand.vmem [shape: f32[1,64], index: 2, kind: input, shape index: {}]   ;;  %s1547_s3 = inlined_call_operand.vmem [shape: f32[2,8,16,64], index: 3, kind: output, shape index: {}]  }
   0x1   :  { %s1309_s14 = smov 0  }
   0x2 LB: > { %s25_s15 = sadd.s32 1, %s1278_s13  ;;  %p885_p0 = scmp.ge.s32.totalorder %s1282_s14, 1  ;;  %s1282_s14 = sphi %s1309_s14, %s13_s14   ;;  %s1278_s13 = sphi %s1307_s13, %s1549_s13   ;;  %s1274_s12 = sphi %s1305_s12, %s1548_s12  }
   0x3   : > { %p27_p1 = scmp.ge.s32.totalorder %s25_s15, 2  ;;  %p158_p2 = scmp.lt.s32.totalorder %s1282_s14, 3 }
   0x5   : > { %s1551_s15 = smov (%p27_p1, %s25_s15), 0  ;;  %p159_p3 = pnand %p885_p0, %p158_p2 }
   0x6   : > { %v890_v0 = vld [vmem:[%s1545_s1 + $0x40] sm:$0xff] (!%p159_p3)  ;;  %v891_v1 = vld [vmem:[%s1545_s1 + $0x48] sm:$0xff] (!%p159_p3)  ;;  %p191_p4 = scmp.lt.s32.totalorder (!%p159_p3), %s1274_s12, 1  ;;  %v892_v5 = vld [vmem:[%s1545_s1 + $0x50] sm:$0xff] (!%p159_p3)  ;;  %v1284_v7 = vmov (!%p159_p3), 0.0   ;;  %vm243_vm0 = vcmask (!%p159_p3), 523264  }
   0x7   : > { %162 = sbr.rel (%p159_p3) target bundleno = 288 (0x120), region = 32  ;;  %v226_v2 = vld [vmem:[%s1545_s1] sm:$0xff] (!%p159_p3)  ;;  %v1147_v3 = vpack.c.bf16 (!%p159_p3), %v891_v1, %v890_v0  ;;  %v227_v4 = vld [vmem:[%s1545_s1 + $0x8] sm:$0xff] (!%p159_p3)  ;;  %v893_v6 = vld [vmem:[%s1545_s1 + $0x58] sm:$0xff] (!%p159_p3)  ;;  %1083 = vmatprep.mubr.f32.mxu0 (!%p159_p3), %v1284_v7 }
   0x8   : > { %v1163_v8 = vpack.c.bf16 (!%p159_p3), %v227_v4, %v226_v2  ;;  %v1151_v9 = vpack.c.bf16 (!%p159_p3), %v893_v6, %v892_v5  ;;  %v228_v10 = vld [vmem:[%s1545_s1 + $0x10] sm:$0xff] (!%p159_p3)  ;;  %v229_v11 = vld [vmem:[%s1545_s1 + $0x18] sm:$0xff] (!%p159_p3)  ;;  %v894_v12 = vld [vmem:[%s1545_s1 + $0x60] sm:$0xff] (!%p159_p3) }
   0x9   : > { %1148 = vmatprep.subr.bf16.mxu1 (!%p159_p3), %v1147_v3  ;;  %v1353_v13 = vpack.c.bf16 (!%p159_p3), %v229_v11, %v228_v10  ;;  %v895_v14 = vld [vmem:[%s1545_s1 + $0x68] sm:$0xff] (!%p159_p3)  ;;  %v230_v15 = vld [vmem:[%s1545_s1 + $0x20] sm:$0xff] (!%p159_p3)  ;;  %v896_v19 = vld [vmem:[%s1545_s1 + $0x70] sm:$0xff] (!%p159_p3) }
   0xa   : > { %v231_v16 = vld [vmem:[%s1545_s1 + $0x28] sm:$0xff] (!%p159_p3)  ;;  %1164 = vmatprep.subr.bf16.mxu0 (!%p159_p3), %v1163_v8  ;;  %1150 = vmatpush3.bf16.msra.mxu1 (!%p159_p3), %v1147_v3  ;;  %v1155_v17 = vpack.c.bf16 (!%p159_p3), %v895_v14, %v894_v12  ;;  %v897_v20 = vld [vmem:[%s1545_s1 + $0x78] sm:$0xff] (!%p159_p3)  ;;  %v232_v22 = vld [vmem:[%s1545_s1 + $0x30] sm:$0xff] (!%p159_p3) }
   0xb   : > { %1166 = vmatpush3.bf16.msra.mxu0 (!%p159_p3), %v1163_v8  ;;  %1152 = vmatprep.subr.bf16.mxu1 (!%p159_p3), %v1151_v9  ;;  %v1171_v18 = vpack.c.bf16 (!%p159_p3), %v231_v16, %v230_v15  ;;  %v233_v23 = vld [vmem:[%s1545_s1 + $0x38] sm:$0xff] (!%p159_p3)  ;;  %v1159_v24 = vpack.c.bf16 (!%p159_p3), %v897_v20, %v896_v19  ;;  %v928_v26 = vld [vmem:[%s1545_s1 + $0x80] sm:$0xff] (!%p159_p3)  ;;  %v929_v27 = vld [vmem:[%s1545_s1 + $0x88] sm:$0xff] (!%p159_p3) }
   0xc   : > { %1168 = vmatprep.subr.bf16.mxu0 (!%p159_p3), %v1353_v13  ;;  %v1175_v25 = vpack.c.bf16 (!%p159_p3), %v233_v23, %v232_v22  ;;  %v1179_v28 = vpack.c.bf16 (!%p159_p3), %v929_v27, %v928_v26  ;;  %v930_v29 = vld [vmem:[%s1545_s1 + $0x90] sm:$0xff] (!%p159_p3)  ;;  %v931_v30 = vld [vmem:[%s1545_s1 + $0x98] sm:$0xff] (!%p159_p3)  ;;  %v932_v34 = vld [vmem:[%s1545_s1 + $0xa0] sm:$0xff] (!%p159_p3) }
   0xd   : > { %v1183_v33 = vpack.c.bf16 (!%p159_p3), %v931_v30, %v930_v29  ;;  %v933_v35 = vld [vmem:[%s1545_s1 + $0xa8] sm:$0xff] (!%p159_p3)  ;;  %v934_v39 = vld [vmem:[%s1545_s1 + $0xb0] sm:$0xff] (!%p159_p3)  ;;  %v935_v40 = vld [vmem:[%s1545_s1 + $0xb8] sm:$0xff] (!%p159_p3) }
   0xe   : > { %s1553_s12 = smov (!%p191_p4, %s1274_s12), 1  ;;  %1154 = vmatpush3.bf16.msra.mxu1 %v1151_v9  ;;  %v1187_v38 = vpack.c.bf16 %v933_v35, %v932_v34  ;;  %v1191_v43 = vpack.c.bf16 %v935_v40, %v934_v39  ;;  %v1478_v62 = vld [vmem:[%s1546_s2] ss:$0 sm:$0xff] }
   0xf   : > { %s953_s17 = sshll.u32 %s1553_s12, 7  ;;  %1170 = vmatpush3.bf16.msra.mxu0 %v1353_v13  ;;  %1156 = vmatprep.subr.bf16.mxu1 %v1155_v17 }
  0x10   : > { %s1370_s20 = scalar_lea.vmem %s1544_s0, %s953_s17  ;;  %1172 = vmatprep.subr.bf16.mxu0 %v1171_v18  ;;  %s1485_s27 = scalar_lea.vmem %s1547_s3, %s953_s17 }
  0x11   : > { %v210_v21 = vld [vmem:[%s1370_s20] sm:$0xff]  ;;  %v211_v31 = vld [vmem:[%s1370_s20 + $0x8] sm:$0xff]  ;;  %v212_v32 = vld [vmem:[%s1370_s20 + $0x10] sm:$0xff] }
  0x12   : > { %1043 = vmatprep.mubr.msk.f32.mxu1 %vm243_vm0, %v210_v21  ;;  %1158 = vmatpush3.bf16.msra.mxu1 %v1155_v17  ;;  %v213_v36 = vld [vmem:[%s1370_s20 + $0x18] sm:$0xff]  ;;  %v214_v37 = vld [vmem:[%s1370_s20 + $0x20] sm:$0xff]  ;;  %v215_v41 = vld [vmem:[%s1370_s20 + $0x28] sm:$0xff] }
  0x13   : > { %1174 = vmatpush3.bf16.msra.mxu0 %v1171_v18  ;;  %1160 = vmatprep.subr.bf16.mxu1 %v1159_v24  ;;  %v216_v42 = vld [vmem:[%s1370_s20 + $0x30] sm:$0xff]  ;;  %v217_v44 = vld [vmem:[%s1370_s20 + $0x38] sm:$0xff]  ;;  %v218_v45 = vld [vmem:[%s1370_s20 + $0x40] sm:$0xff] }
  0x14   : > { %1176 = vmatprep.subr.bf16.mxu0 %v1175_v25  ;;  %v219_v46 = vld [vmem:[%s1370_s20 + $0x48] sm:$0xff]  ;;  %v220_v47 = vld [vmem:[%s1370_s20 + $0x50] sm:$0xff]  ;;  %v221_v48 = vld [vmem:[%s1370_s20 + $0x58] sm:$0xff] }
  0x15   : > { %v222_v49 = vld [vmem:[%s1370_s20 + $0x60] sm:$0xff]  ;;  %v223_v50 = vld [vmem:[%s1370_s20 + $0x68] sm:$0xff]  ;;  %v224_v51 = vld [vmem:[%s1370_s20 + $0x70] sm:$0xff] }
  0x16   : > { %1162 = vmatpush3.bf16.msra.mxu1 %v1159_v24  ;;  %v225_v52 = vld [vmem:[%s1370_s20 + $0x78] sm:$0xff] }
  0x17   : > { %1178 = vmatpush3.bf16.msra.mxu0 %v1175_v25  ;;  %1195 = vmatprep.subr.bf16.mxu1 %v1163_v8 }
  0x18   : > { %1180 = vmatprep.subr.bf16.mxu0 %v1179_v28 }
  0x19   : > { %1044 = vmatmul.mubr.msk.f32.vlgmr.msra.gmra.mrb[0].mxu1 %vm243_vm0, %v211_v31 }
  0x1a   : > { %1084 = vmatmul.mubr.f32.vlgmr.msra.gmra.mrb[0].mxu0 %v1284_v7  ;;  %1199 = vmatpush3.bf16.msra.mxu1 %v1163_v8 }
  0x1b   : > { %1182 = vmatpush3.bf16.msra.mxu0 %v1179_v28  ;;  %1046 = vmatprep.mubr.msk.f32.mxu1 %vm243_vm0, %v212_v32 }
  0x1c   : > { %1086 = vmatprep.mubr.msk.f32.mxu0 %vm243_vm0, %v210_v21  ;;  %1184 = vmatprep.subr.bf16.mxu0 %v1183_v33 }
  0x1d   : > { %1047 = vmatmul.mubr.msk.f32.gmra.mrb[2].mxu1 %vm243_vm0, %v213_v36  ;;  %1196 = vmatprep.subr.bf16.mxu1 %v1353_v13 }
  0x1e   : > { %1087 = vmatmul.mubr.msk.f32.gmra.mrb[2].mxu0 %vm243_vm0, %v211_v31  ;;  %1049 = vmatprep.mubr.msk.f32.mxu1 %vm243_vm0, %v214_v37 }
  0x1f   : > { %1186 = vmatpush3.bf16.msra.mxu0 %v1183_v33  ;;  %1089 = vmatprep.mubr.msk.f32.mxu0 %vm243_vm0, %v212_v32 }
  0x20   : > { %1188 = vmatprep.subr.bf16.mxu0 %v1187_v38  ;;  %1200 = vmatpush3.bf16.msra.mxu1 %v1353_v13 }
  0x21   : > { %1050 = vmatmul.mubr.msk.f32.gmra.mrb[4].mxu1 %vm243_vm0, %v215_v41  ;;  %1197 = vmatprep.subr.bf16.mxu1 %v1171_v18 }
  0x22   : > { %1090 = vmatmul.mubr.msk.f32.gmra.mrb[4].mxu0 %vm243_vm0, %v213_v36  ;;  %1052 = vmatprep.mubr.msk.f32.mxu1 %vm243_vm0, %v216_v42 }
  0x23   : > { %1190 = vmatpush3.bf16.msra.mxu0 %v1187_v38  ;;  %1092 = vmatprep.mubr.msk.f32.mxu0 %vm243_vm0, %v214_v37 }
  0x24   : > { %1192 = vmatprep.subr.bf16.mxu0 %v1191_v43  ;;  %1201 = vmatpush3.bf16.msra.mxu1 %v1171_v18 }
  0x25   : > { %1053 = vmatmul.mubr.msk.f32.gmra.mrb[6].mxu1 %vm243_vm0, %v217_v44  ;;  %1198 = vmatprep.subr.bf16.mxu1 %v1175_v25 }
  0x26   : > { %1093 = vmatmul.mubr.msk.f32.gmra.mrb[6].mxu0 %vm243_vm0, %v215_v41  ;;  %1055 = vmatprep.mubr.msk.f32.mxu1 %vm243_vm0, %v218_v45 }
  0x27   : > { %1194 = vmatpush3.bf16.msra.mxu0 %v1191_v43  ;;  %1123 = vmatprep.mubr.msk.f32.mxu0 %vm243_vm0, %v212_v32 }
  0x28   : > { %1202 = vmatpush3.bf16.msra.mxu1 %v1175_v25 }
  0x29   : > { %1056 = vmatmul.mubr.msk.f32.gmra.mrb[8].mxu1 %vm243_vm0, %v219_v46 }
  0x2a   : > { %1124 = vmatmul.mubr.msk.f32.vlgmr.msra.gmra.mrb[0].mxu0 %vm243_vm0, %v213_v36  ;;  %1058 = vmatprep.mubr.msk.f32.mxu1 %vm243_vm0, %v220_v47 }
  0x2b   : > { %1126 = vmatprep.mubr.msk.f32.mxu0 %vm243_vm0, %v214_v37 }
  0x2d   : > { %1059 = vmatmul.mubr.msk.f32.gmra.mrb[10].mxu1 %vm243_vm0, %v221_v48 }
  0x2e   : > { %1127 = vmatmul.mubr.msk.f32.gmra.mrb[2].mxu0 %vm243_vm0, %v215_v41  ;;  %1061 = vmatprep.mubr.msk.f32.mxu1 %vm243_vm0, %v222_v49 }
  0x2f   : > { %1129 = vmatprep.mubr.msk.f32.mxu0 %vm243_vm0, %v216_v42 }
  0x31   : > { %1062 = vmatmul.mubr.msk.f32.gmra.mrb[12].mxu1 %vm243_vm0, %v223_v50 }
  0x32   : > { %1130 = vmatmul.mubr.msk.f32.gmra.mrb[4].mxu0 %vm243_vm0, %v217_v44  ;;  %1064 = vmatprep.mubr.msk.f32.mxu1 %vm243_vm0, %v224_v51 }
  0x33   : > { %1132 = vmatprep.mubr.msk.f32.mxu0 %vm243_vm0, %v218_v45 }
  0x35   : > { %1065 = vmatmul.mubr.msk.f32.gmra.mrb[14].mxu1 %vm243_vm0, %v225_v52 }
  0x36   : > { %1133 = vmatmul.mubr.msk.f32.gmra.mrb[6].mxu0 %vm243_vm0, %v219_v46  ;;  %1095 = vmatprep.mubr.msk.f32.mxu1 %vm243_vm0, %v216_v42 }
  0x37   : > { %1135 = vmatprep.mubr.msk.f32.mxu0 %vm243_vm0, %v220_v47 }
  0x39   : > { %1096 = vmatmul.mubr.msk.f32.vlgmr.msra.gmra.mrb[8].mxu1 %vm243_vm0, %v217_v44 }
  0x3a   : > { %1136 = vmatmul.mubr.msk.f32.gmra.mrb[8].mxu0 %vm243_vm0, %v221_v48  ;;  %1098 = vmatprep.mubr.msk.f32.mxu1 %vm243_vm0, %v218_v45 }
  0x3b   : > { %1138 = vmatprep.mubr.msk.f32.mxu0 %vm243_vm0, %v222_v49 }
  0x3d   : > { %1099 = vmatmul.mubr.msk.f32.gmra.mrb[10].mxu1 %vm243_vm0, %v219_v46 }
  0x3e   : > { %1139 = vmatmul.mubr.msk.f32.gmra.mrb[10].mxu0 %vm243_vm0, %v223_v50  ;;  %1101 = vmatprep.mubr.msk.f32.mxu1 %vm243_vm0, %v220_v47 }
  0x3f   : > { %1141 = vmatprep.mubr.msk.f32.mxu0 %vm243_vm0, %v224_v51 }
  0x41   : > { %1102 = vmatmul.mubr.msk.f32.gmra.mrb[12].mxu1 %vm243_vm0, %v221_v48 }
  0x42   : > { %1142 = vmatmul.mubr.msk.f32.gmra.mrb[12].mxu0 %vm243_vm0, %v225_v52  ;;  %1104 = vmatprep.mubr.msk.f32.mxu1 %vm243_vm0, %v222_v49 }
  0x43   : > { %1144 = vmatprep.mubr.f32.mxu0 %v1284_v7 }
  0x45   : > { %1105 = vmatmul.mubr.msk.f32.gmra.mrb[14].mxu1 %vm243_vm0, %v223_v50 }
  0x46   : > { %1145 = vmatmul.mubr.f32.gmra.mrb[14].mxu0 %v1284_v7 }
  0xec   : > { %v1045_v53 = vpop.f32.mrb[0].mxu1 }
  0xed   : > { %v358_v54 = vpop.f32.mrb[1].mxu1 }
  0xf0   : > { %v1048_v55 = vpop.f32.mrb[2].mxu1 }
  0xf1   : > { %v368_v56 = vpop.f32.mrb[3].mxu1 }
  0xf4   : > { %v1051_v57 = vpop.f32.mrb[4].mxu1 }
  0xf5   : > { %v378_v58 = vpop.f32.mrb[5].mxu1 }
  0xf8   : > { %v1054_v59 = vpop.f32.mrb[6].mxu1 }
  0xf9   : > { %v388_v60 = vpop.f32.mrb[7].mxu1 }
  0xfd   : > { %v1125_v61 = vpop.f32.mrb[0].mxu0 }
  0xfe   : > { %v1203_v63 = vadd.f32 %v1125_v61, %v1045_v53  ;;  %v660_v0 = vpop.f32.mrb[1].mxu0 }
  0xff   : > { %v1204_v1 = vadd.f32 %v660_v0, %v358_v54 }
 0x100   : > { %v763_v2 = vadd.f32 %v1203_v63, %v1478_v62 }
 0x101   : > { %v762_v3 = vadd.f32 %v1204_v1, %v1478_v62  ;;  %v1128_v4 = vpop.f32.mrb[2].mxu0 }
 0x102   : > { %779 = vst.msk [vmem:[%s1485_s27 + $0x8] sm:$0xff] %vm243_vm0, %v763_v2  ;;  %v1205_v5 = vadd.f32 %v1128_v4, %v1048_v55  ;;  %v670_v6 = vpop.f32.mrb[3].mxu0 }
 0x103   : > { %778 = vst.msk [vmem:[%s1485_s27] sm:$0xff] %vm243_vm0, %v762_v3  ;;  %v1206_v7 = vadd.f32 %v670_v6, %v368_v56 }
 0x104   : > { %v765_v8 = vadd.f32 %v1205_v5, %v1478_v62 }
 0x105   : > { %v764_v9 = vadd.f32 %v1206_v7, %v1478_v62  ;;  %v1131_v10 = vpop.f32.mrb[4].mxu0 }
 0x106   : > { %781 = vst.msk [vmem:[%s1485_s27 + $0x18] sm:$0xff] %vm243_vm0, %v765_v8  ;;  %v1207_v11 = vadd.f32 %v1131_v10, %v1051_v57  ;;  %v680_v12 = vpop.f32.mrb[5].mxu0 }
 0x107   : > { %780 = vst.msk [vmem:[%s1485_s27 + $0x10] sm:$0xff] %vm243_vm0, %v764_v9  ;;  %v1208_v13 = vadd.f32 %v680_v12, %v378_v58 }
 0x108   : > { %v767_v14 = vadd.f32 %v1207_v11, %v1478_v62 }
 0x109   : > { %v766_v15 = vadd.f32 %v1208_v13, %v1478_v62  ;;  %v1134_v16 = vpop.f32.mrb[6].mxu0 }
 0x10a   : > { %783 = vst.msk [vmem:[%s1485_s27 + $0x28] sm:$0xff] %vm243_vm0, %v767_v14  ;;  %v1209_v17 = vadd.f32 %v1134_v16, %v1054_v59  ;;  %v690_v18 = vpop.f32.mrb[7].mxu0 }
 0x10b   : > { %782 = vst.msk [vmem:[%s1485_s27 + $0x20] sm:$0xff] %vm243_vm0, %v766_v15  ;;  %v1210_v19 = vadd.f32 %v690_v18, %v388_v60 }
 0x10c   : > { %v769_v20 = vadd.f32 %v1209_v17, %v1478_v62  ;;  %v1097_v21 = vpop.f32.mrb[8].mxu1 }
 0x10d   : > { %v768_v22 = vadd.f32 %v1210_v19, %v1478_v62  ;;  %v1137_v23 = vpop.f32.mrb[8].mxu0  ;;  %v546_v24 = vpop.f32.mrb[9].mxu1 }
 0x10e   : > { %785 = vst.msk [vmem:[%s1485_s27 + $0x38] sm:$0xff] %vm243_vm0, %v769_v20  ;;  %v1211_v25 = vadd.f32 %v1137_v23, %v1097_v21  ;;  %v700_v26 = vpop.f32.mrb[9].mxu0 }
 0x10f   : > { %784 = vst.msk [vmem:[%s1485_s27 + $0x30] sm:$0xff] %vm243_vm0, %v768_v22  ;;  %v1212_v27 = vadd.f32 %v700_v26, %v546_v24 }
 0x110   : > { %v771_v28 = vadd.f32 %v1211_v25, %v1478_v62  ;;  %v1100_v29 = vpop.f32.mrb[10].mxu1 }
 0x111   : > { %v770_v30 = vadd.f32 %v1212_v27, %v1478_v62  ;;  %v1140_v31 = vpop.f32.mrb[10].mxu0  ;;  %v556_v32 = vpop.f32.mrb[11].mxu1 }
 0x112   : > { %787 = vst.msk [vmem:[%s1485_s27 + $0x48] sm:$0xff] %vm243_vm0, %v771_v28  ;;  %v1213_v33 = vadd.f32 %v1140_v31, %v1100_v29  ;;  %v710_v34 = vpop.f32.mrb[11].mxu0 }
 0x113   : > { %786 = vst.msk [vmem:[%s1485_s27 + $0x40] sm:$0xff] %vm243_vm0, %v770_v30  ;;  %v1214_v35 = vadd.f32 %v710_v34, %v556_v32 }
 0x114   : > { %v773_v36 = vadd.f32 %v1213_v33, %v1478_v62  ;;  %v1103_v37 = vpop.f32.mrb[12].mxu1 }
 0x115   : > { %v772_v38 = vadd.f32 %v1214_v35, %v1478_v62  ;;  %v1143_v39 = vpop.f32.mrb[12].mxu0  ;;  %v566_v40 = vpop.f32.mrb[13].mxu1 }
 0x116   : > { %789 = vst.msk [vmem:[%s1485_s27 + $0x58] sm:$0xff] %vm243_vm0, %v773_v36  ;;  %v1215_v41 = vadd.f32 %v1143_v39, %v1103_v37  ;;  %v720_v42 = vpop.f32.mrb[13].mxu0 }
 0x117   : > { %788 = vst.msk [vmem:[%s1485_s27 + $0x50] sm:$0xff] %vm243_vm0, %v772_v38  ;;  %v1216_v43 = vadd.f32 %v720_v42, %v566_v40 }
 0x118   : > { %v775_v44 = vadd.f32 %v1215_v41, %v1478_v62  ;;  %v1106_v45 = vpop.f32.mrb[14].mxu1 }
 0x119   : > { %v774_v46 = vadd.f32 %v1216_v43, %v1478_v62  ;;  %v1146_v47 = vpop.f32.mrb[14].mxu0  ;;  %v576_v48 = vpop.f32.mrb[15].mxu1 }
 0x11a   : > { %791 = vst.msk [vmem:[%s1485_s27 + $0x68] sm:$0xff] %vm243_vm0, %v775_v44  ;;  %v1217_v49 = vadd.f32 %v1146_v47, %v1106_v45  ;;  %v730_v50 = vpop.f32.mrb[15].mxu0 }
 0x11b   : > { %790 = vst.msk [vmem:[%s1485_s27 + $0x60] sm:$0xff] %vm243_vm0, %v774_v46  ;;  %v1218_v51 = vadd.f32 %v730_v50, %v576_v48 }
 0x11c   : > { %v777_v52 = vadd.f32 %v1217_v49, %v1478_v62 }
 0x11d   : > { %v776_v53 = vadd.f32 %v1218_v51, %v1478_v62 }
 0x11e   : > { %793 = vst.msk [vmem:[%s1485_s27 + $0x78] sm:$0xff] %vm243_vm0, %v777_v52 }
 0x11f   : > { %792 = vst.msk [vmem:[%s1485_s27 + $0x70] sm:$0xff] %vm243_vm0, %v776_v53 }
 0x120 PF: > { %s13_s14 = sadd.s32 1, %s1282_s14   ;;  %s1548_s12 = smov %s1278_s13 }
 0x121   : > { %p10_p5 = scmp.ge.s32.totalorder %s13_s14, 4   ;;  %s1549_s13 = smov %s1551_s15 }
 0x123   :  { %12 = sbr.rel (!%p10_p5) target bundleno = 2 (0x2), region = 64 }

</bundles_post_ra>
